<compile_context>
chip_gen: v7x
topology: tpu7x:2x2x1
jax: 0.10.0
libtpu: 0.0.40
codegen_flags: <defaults>
</compile_context>

<pallas_src>
import functools

import jax
import jax.numpy as jnp
from jax.experimental import pallas as pl
from jax.experimental.pallas import tpu as pltpu


def _apply_activation(pre, activation):
    if activation == "Tanh":
        return jnp.tanh(pre)
    if activation == "ReLU":
        return jnp.maximum(pre, 0.0)
    return pre  # identity / linear state neuron


def _state_kernel(xT_ref, at_ref, bt_ref, w_ref, yT_ref, h_ref,
                  *, chunk, batch, activation):
    """One grid step == one time-chunk of the state-space recurrence (transposed).

    xT_ref: (in_dim, chunk*batch)       lane-dense inputs, column = t*batch + b
    at_ref: (order, order)              A^T
    bt_ref: (order, in_dim)             B^T
    w_ref:  (out_dim, order + in_dim)   fused output weights [C ; D]^T
    yT_ref: (out_dim, chunk*batch)      lane-dense outputs
    h_ref:  (order, batch)              VMEM scratch: state h^T carried across chunks
    """
    c = pl.program_id(0)

    @pl.when(c == 0)
    def _():
        h_ref[...] = jnp.zeros_like(h_ref)

    xT = xT_ref[...]                       # (in_dim, chunk*batch)
    at = at_ref[...]                       # (order, order)

    # Bulk (hoisted) input projection for the whole chunk: XB^T = B^T @ X^T.
    xbT = jnp.dot(bt_ref[...], xT, preferred_element_type=jnp.float32)

    # Serial recurrence: only A^T @ h^T + tanh on the time-critical path.
    # chunk is small & static -> fully-unrolled loop; h_t stay register-resident.
    h = h_ref[...]                         # (order, batch)
    hs = []
    for t in range(chunk):
        xb_t = xbT[:, t * batch:(t + 1) * batch]   # static lane-slice of a value
        pre = jnp.dot(at, h, preferred_element_type=jnp.float32) + xb_t
        h = _apply_activation(pre, activation)
        hs.append(h)
    h_ref[...] = h                         # carry state to the next chunk

    # Fused (hoisted) output projection: Y^T = [C^T | D^T] @ [H^T ; X^T].
    hT = jnp.concatenate(hs, axis=1)                   # (order, chunk*batch)
    hx = jnp.concatenate([hT, xT], axis=0)             # (order+in_dim, chunk*batch)
    yT = jnp.dot(w_ref[...], hx, preferred_element_type=jnp.float32)
    yT_ref[...] = yT.astype(yT_ref.dtype)              # one full-lane slab store


def _pick_chunk(seq, batch, cap):
    """Largest time-chunk <= cap; multi-chunk blocks must be 128-lane aligned."""
    if seq <= cap:
        return seq                                      # single chunk, full-array block
    for t in range(min(seq, cap), 0, -1):
        if seq % t == 0 and (t * batch) % 128 == 0:
            return t
    # Fallback: single chunk (block == full array, always layout-legal), cap ignored.
    return seq


def state_model_forward(x, params, *, activation="Tanh", max_chunk=32):
    """x: (batch, seq, in_dim) float32 -> (batch, seq, out_dim) float32."""
    A, B, C, D = params["A"], params["B"], params["C"], params["D"]
    batch, seq, in_dim = x.shape
    order = A.shape[0]
    out_dim = C.shape[1]

    chunk = _pick_chunk(seq, batch, max_chunk)
    num_chunks = seq // chunk

    # Lane-dense time-major view: X^T[:, t*batch + b] = x[b, t, :].  Tiny transpose.
    xT = jnp.transpose(x, (2, 1, 0)).reshape(in_dim, seq * batch)
    At = A.T                                            # (order, order)
    Bt = B.T                                            # (order, in_dim)
    W = jnp.concatenate([C, D], axis=0).T               # (out_dim, order+in_dim)

    kernel = functools.partial(_state_kernel, chunk=chunk, batch=batch,
                               activation=activation)

    n_param = order * order + in_dim * order + order * out_dim + in_dim * out_dim
    cost = pl.CostEstimate(
        flops=2 * seq * batch * (order * order
                                 + order * (in_dim + out_dim)
                                 + in_dim * out_dim),
        transcendentals=seq * batch * order,
        bytes_accessed=4 * (seq * batch * (in_dim + out_dim) + n_param),
    )

    yT = pl.pallas_call(
        kernel,
        out_shape=jax.ShapeDtypeStruct((out_dim, seq * batch), x.dtype),
        grid_spec=pltpu.PrefetchScalarGridSpec(
            num_scalar_prefetch=0,
            grid=(num_chunks,),
            in_specs=[
                pl.BlockSpec((in_dim, chunk * batch), lambda c: (0, c)),
                pl.BlockSpec((order, order), lambda c: (0, 0)),
                pl.BlockSpec((order, in_dim), lambda c: (0, 0)),
                pl.BlockSpec((out_dim, order + in_dim), lambda c: (0, 0)),
            ],
            out_specs=pl.BlockSpec((out_dim, chunk * batch), lambda c: (0, c)),
            scratch_shapes=[
                pltpu.VMEM((order, batch), jnp.float32),   # carried state h^T
            ],
        ),
        compiler_params=pltpu.CompilerParams(
            # Recurrence over time: chunks must run sequentially.
            dimension_semantics=("arbitrary",),
        ),
        cost_estimate=cost,
    )(xT, At, Bt, W)

    # (out_dim, seq*batch) -> (batch, seq, out_dim)
    return jnp.transpose(yT.reshape(out_dim, seq, batch), (2, 1, 0))


def init_state_model_params(order, in_dim, out_dim, key):
    """Deterministic synthetic parameters (shapes match StateNeuron)."""
    k_a, k_b, k_c, k_d = jax.random.split(key, 4)
    scale = 0.1
    return {
        "A": scale * jax.random.normal(k_a, (order, order), jnp.float32),
        "B": scale * jax.random.normal(k_b, (in_dim, order), jnp.float32),
        "C": scale * jax.random.normal(k_c, (order, out_dim), jnp.float32),
        "D": scale * jax.random.normal(k_d, (in_dim, out_dim), jnp.float32),
    }
    # TODO(synk): observer mode (y_obs / Luenberger gain L) not implemented —
    # StateModel.forward with y_obs=None (observer=False) never exercises it.


def _reference_forward(x, params, activation="Tanh"):
    """Pure-JAX reference of the same recurrence (correctness check)."""
    A, B, C, D = params["A"], params["B"], params["C"], params["D"]
    batch, _, _ = x.shape
    order = A.shape[0]

    def step(h, u):
        pre = h @ A + u @ B
        h_new = _apply_activation(pre, activation)
        y = h_new @ C + u @ D
        return h_new, y

    h0 = jnp.zeros((batch, order), jnp.float32)
    _, ys = jax.lax.scan(step, h0, jnp.transpose(x, (1, 0, 2)))
    return jnp.transpose(ys, (1, 0, 2))


if __name__ == "__main__":
    key = jax.random.PRNGKey(0)

    # Toy shapes consistent with StateModel(order=16, in_dim=4, out_dim=4).
    order, in_dim, out_dim = 16, 4, 4

    # Case 1: batch=2, seq=8 -> single chunk (whole sequence in one grid step).
    batch, seq = 2, 8
    k_params, k_x = jax.random.split(key)
    params = init_state_model_params(order, in_dim, out_dim, k_params)
    x = jax.random.normal(k_x, (batch, seq, in_dim), jnp.float32)

    y = jax.block_until_ready(state_model_forward(x, params, activation="Tanh"))
    y_ref = _reference_forward(x, params, activation="Tanh")
    assert y.shape == (batch, seq, out_dim)
    assert jnp.allclose(y, y_ref, atol=1e-5, rtol=1e-5), "mismatch vs reference (toy)"

    # Case 2: batch=4, seq=32 -> still a single grid step (chunk*batch = 128 lanes).
    batch2, seq2 = 4, 32
    k_params2, k_x2 = jax.random.split(jax.random.fold_in(key, 1))
    params2 = init_state_model_params(order, in_dim, out_dim, k_params2)
    x2 = jax.random.normal(k_x2, (batch2, seq2, in_dim), jnp.float32)

    y2 = jax.block_until_ready(state_model_forward(x2, params2, activation="Tanh"))
    y2_ref = _reference_forward(x2, params2, activation="Tanh")
    assert y2.shape == (batch2, seq2, out_dim)
    assert jnp.allclose(y2, y2_ref, atol=1e-5, rtol=1e-5), "mismatch vs reference (32)"

    # Case 3: batch=4, seq=64, max_chunk=32 -> 2 lane-aligned chunks; exercises the
    # multi-chunk path (state carried across grid steps).
    batch3, seq3 = 4, 64
    k_params3, k_x3 = jax.random.split(jax.random.fold_in(key, 2))
    params3 = init_state_model_params(order, in_dim, out_dim, k_params3)
    x3 = jax.random.normal(k_x3, (batch3, seq3, in_dim), jnp.float32)

    y3 = jax.block_until_ready(
        state_model_forward(x3, params3, activation="Tanh", max_chunk=32))
    y3_ref = _reference_forward(x3, params3, activation="Tanh")
    assert y3.shape == (batch3, seq3, out_dim)
    assert jnp.allclose(y3, y3_ref, atol=1e-5, rtol=1e-5), "mismatch vs reference (chunked)"

    print("KERNEL_OK")
</pallas_src>

<mosaic_0001>
module attributes {stable_mosaic.version = 11 : i64} {
  func.func @_state_kernel(%arg0: i32, %arg1: memref<4x16xf32, #tpu.memory_space<vmem>>, %arg2: memref<16x16xf32, #tpu.memory_space<vmem>>, %arg3: memref<16x4xf32, #tpu.memory_space<vmem>>, %arg4: memref<4x20xf32, #tpu.memory_space<vmem>>, %arg5: memref<4x16xf32, #tpu.memory_space<vmem>>, %arg6: memref<16x2xf32, #tpu.memory_space<vmem>>) attributes {dimension_semantics = [#tpu.dimension_semantics<arbitrary>], iteration_bounds = array<i64: 1>, scalar_prefetch = 0 : i64, scratch_operands = 1 : i64, tpu.core_type = #tpu.core_type<tc>, window_params = [{transform_indices = @transform_0, window_bounds = array<i64: 4, 16>}, {pipeline_mode = #tpu.pipeline_mode<synchronous>, transform_indices = @transform_1, window_bounds = array<i64: 16, 16>}, {pipeline_mode = #tpu.pipeline_mode<synchronous>, transform_indices = @transform_2, window_bounds = array<i64: 16, 4>}, {pipeline_mode = #tpu.pipeline_mode<synchronous>, transform_indices = @transform_3, window_bounds = array<i64: 4, 20>}, {transform_indices = @transform_4, window_bounds = array<i64: 4, 16>}]} {
    %c0_i32 = arith.constant 0 : i32
    %0 = arith.cmpi eq, %arg0, %c0_i32 : i32
    %1 = arith.extui %0 : i1 to i32
    %c0_i32_0 = arith.constant 0 : i32
    %2 = arith.cmpi ne, %1, %c0_i32_0 : i32
    scf.if %2 {
      %cst_23 = arith.constant 0.000000e+00 : f32
      %46 = vector.broadcast %cst_23 : f32 to vector<16x2xf32>
      %c0_24 = arith.constant 0 : index
      %c0_25 = arith.constant 0 : index
      %47 = vector.load %arg6[%c0_24, %c0_25] : memref<16x2xf32, #tpu.memory_space<vmem>>, vector<16x2xf32>
      tpu.vector_store %arg6[%c0_24, %c0_25], %46 {strides = array<i32>} : memref<16x2xf32, #tpu.memory_space<vmem>>, vector<16x2xf32>,
    } else {
    }
    %c0 = arith.constant 0 : index
    %c0_1 = arith.constant 0 : index
    %3 = vector.load %arg1[%c0, %c0_1] : memref<4x16xf32, #tpu.memory_space<vmem>>, vector<4x16xf32>
    %c0_2 = arith.constant 0 : index
    %c0_3 = arith.constant 0 : index
    %4 = vector.load %arg2[%c0_2, %c0_3] : memref<16x16xf32, #tpu.memory_space<vmem>>, vector<16x16xf32>
    %c0_4 = arith.constant 0 : index
    %c0_5 = arith.constant 0 : index
    %5 = vector.load %arg3[%c0_4, %c0_5] : memref<16x4xf32, #tpu.memory_space<vmem>>, vector<16x4xf32>
    %cst = arith.constant dense<0.000000e+00> : vector<16x16xf32>
    %6 = tpu.matmul %5, %3, %cst {dimension_numbers = #tpu.dot_dimension_numbers<[1], [0], [0], [1], [0, 0, 1, 1], [], []>} : vector<16x4xf32>, vector<4x16xf32>, vector<16x16xf32> -> vector<16x16xf32>
    %c0_6 = arith.constant 0 : index
    %c0_7 = arith.constant 0 : index
    %7 = vector.load %arg6[%c0_6, %c0_7] : memref<16x2xf32, #tpu.memory_space<vmem>>, vector<16x2xf32>
    %8 = vector.extract_strided_slice %6 {offsets = [0, 0], sizes = [16, 2], strides = [1, 1]} : vector<16x16xf32> to vector<16x2xf32>
    %cst_8 = arith.constant dense<0.000000e+00> : vector<16x2xf32>
    %9 = tpu.matmul %4, %7, %cst_8 {dimension_numbers = #tpu.dot_dimension_numbers<[1], [0], [0], [1], [0, 0, 1, 1], [], []>} : vector<16x16xf32>, vector<16x2xf32>, vector<16x2xf32> -> vector<16x2xf32>
    %10 = arith.addf %9, %8 : vector<16x2xf32>
    %11 = math.tanh %10 : vector<16x2xf32>
    %12 = vector.extract_strided_slice %6 {offsets = [0, 2], sizes = [16, 2], strides = [1, 1]} : vector<16x16xf32> to vector<16x2xf32>
    %cst_9 = arith.constant dense<0.000000e+00> : vector<16x2xf32>
    %13 = tpu.matmul %4, %11, %cst_9 {dimension_numbers = #tpu.dot_dimension_numbers<[1], [0], [0], [1], [0, 0, 1, 1], [], []>} : vector<16x16xf32>, vector<16x2xf32>, vector<16x2xf32> -> vector<16x2xf32>
    %14 = arith.addf %13, %12 : vector<16x2xf32>
    %15 = math.tanh %14 : vector<16x2xf32>
    %16 = vector.extract_strided_slice %6 {offsets = [0, 4], sizes = [16, 2], strides = [1, 1]} : vector<16x16xf32> to vector<16x2xf32>
    %cst_10 = arith.constant dense<0.000000e+00> : vector<16x2xf32>
    %17 = tpu.matmul %4, %15, %cst_10 {dimension_numbers = #tpu.dot_dimension_numbers<[1], [0], [0], [1], [0, 0, 1, 1], [], []>} : vector<16x16xf32>, vector<16x2xf32>, vector<16x2xf32> -> vector<16x2xf32>
    %18 = arith.addf %17, %16 : vector<16x2xf32>
    %19 = math.tanh %18 : vector<16x2xf32>
    %20 = vector.extract_strided_slice %6 {offsets = [0, 6], sizes = [16, 2], strides = [1, 1]} : vector<16x16xf32> to vector<16x2xf32>
    %cst_11 = arith.constant dense<0.000000e+00> : vector<16x2xf32>
    %21 = tpu.matmul %4, %19, %cst_11 {dimension_numbers = #tpu.dot_dimension_numbers<[1], [0], [0], [1], [0, 0, 1, 1], [], []>} : vector<16x16xf32>, vector<16x2xf32>, vector<16x2xf32> -> vector<16x2xf32>
    %22 = arith.addf %21, %20 : vector<16x2xf32>
    %23 = math.tanh %22 : vector<16x2xf32>
    %24 = vector.extract_strided_slice %6 {offsets = [0, 8], sizes = [16, 2], strides = [1, 1]} : vector<16x16xf32> to vector<16x2xf32>
    %cst_12 = arith.constant dense<0.000000e+00> : vector<16x2xf32>
    %25 = tpu.matmul %4, %23, %cst_12 {dimension_numbers = #tpu.dot_dimension_numbers<[1], [0], [0], [1], [0, 0, 1, 1], [], []>} : vector<16x16xf32>, vector<16x2xf32>, vector<16x2xf32> -> vector<16x2xf32>
    %26 = arith.addf %25, %24 : vector<16x2xf32>
    %27 = math.tanh %26 : vector<16x2xf32>
    %28 = vector.extract_strided_slice %6 {offsets = [0, 10], sizes = [16, 2], strides = [1, 1]} : vector<16x16xf32> to vector<16x2xf32>
    %cst_13 = arith.constant dense<0.000000e+00> : vector<16x2xf32>
    %29 = tpu.matmul %4, %27, %cst_13 {dimension_numbers = #tpu.dot_dimension_numbers<[1], [0], [0], [1], [0, 0, 1, 1], [], []>} : vector<16x16xf32>, vector<16x2xf32>, vector<16x2xf32> -> vector<16x2xf32>
    %30 = arith.addf %29, %28 : vector<16x2xf32>
    %31 = math.tanh %30 : vector<16x2xf32>
    %32 = vector.extract_strided_slice %6 {offsets = [0, 12], sizes = [16, 2], strides = [1, 1]} : vector<16x16xf32> to vector<16x2xf32>
    %cst_14 = arith.constant dense<0.000000e+00> : vector<16x2xf32>
    %33 = tpu.matmul %4, %31, %cst_14 {dimension_numbers = #tpu.dot_dimension_numbers<[1], [0], [0], [1], [0, 0, 1, 1], [], []>} : vector<16x16xf32>, vector<16x2xf32>, vector<16x2xf32> -> vector<16x2xf32>
    %34 = arith.addf %33, %32 : vector<16x2xf32>
    %35 = math.tanh %34 : vector<16x2xf32>
    %36 = vector.extract_strided_slice %6 {offsets = [0, 14], sizes = [16, 2], strides = [1, 1]} : vector<16x16xf32> to vector<16x2xf32>
    %cst_15 = arith.constant dense<0.000000e+00> : vector<16x2xf32>
    %37 = tpu.matmul %4, %35, %cst_15 {dimension_numbers = #tpu.dot_dimension_numbers<[1], [0], [0], [1], [0, 0, 1, 1], [], []>} : vector<16x16xf32>, vector<16x2xf32>, vector<16x2xf32> -> vector<16x2xf32>
    %38 = arith.addf %37, %36 : vector<16x2xf32>
    %39 = math.tanh %38 : vector<16x2xf32>
    %c0_16 = arith.constant 0 : index
    %c0_17 = arith.constant 0 : index
    %40 = vector.load %arg6[%c0_16, %c0_17] : memref<16x2xf32, #tpu.memory_space<vmem>>, vector<16x2xf32>
    tpu.vector_store %arg6[%c0_16, %c0_17], %39 {strides = array<i32>} : memref<16x2xf32, #tpu.memory_space<vmem>>, vector<16x2xf32>,
    %41 = tpu.concatenate %11, %15, %19, %23, %27, %31, %35, %39 in 1 : vector<16x2xf32>, vector<16x2xf32>, vector<16x2xf32>, vector<16x2xf32>, vector<16x2xf32>, vector<16x2xf32>, vector<16x2xf32>, vector<16x2xf32> -> vector<16x16xf32>
    %42 = tpu.concatenate %41, %3 in 0 : vector<16x16xf32>, vector<4x16xf32> -> vector<20x16xf32>
    %c0_18 = arith.constant 0 : index
    %c0_19 = arith.constant 0 : index
    %43 = vector.load %arg4[%c0_18, %c0_19] : memref<4x20xf32, #tpu.memory_space<vmem>>, vector<4x20xf32>
    %cst_20 = arith.constant dense<0.000000e+00> : vector<4x16xf32>
    %44 = tpu.matmul %43, %42, %cst_20 {dimension_numbers = #tpu.dot_dimension_numbers<[1], [0], [0], [1], [0, 0, 1, 1], [], []>} : vector<4x20xf32>, vector<20x16xf32>, vector<4x16xf32> -> vector<4x16xf32>
    %c0_21 = arith.constant 0 : index
    %c0_22 = arith.constant 0 : index
    %45 = vector.load %arg5[%c0_21, %c0_22] : memref<4x16xf32, #tpu.memory_space<vmem>>, vector<4x16xf32>
    tpu.vector_store %arg5[%c0_21, %c0_22], %44 {strides = array<i32>} : memref<4x16xf32, #tpu.memory_space<vmem>>, vector<4x16xf32>,
    return
  }
  func.func @transform_0(%arg0: i32) -> (i32, i32) {
    %c0_i32 = arith.constant 0 : i32
    %c0_i32_0 = arith.constant 0 : i32
    return %c0_i32, %arg0 : i32, i32
  }
  func.func @transform_1(%arg0: i32) -> (i32, i32) {
    %c0_i32 = arith.constant 0 : i32
    %c0_i32_0 = arith.constant 0 : i32
    %c0_i32_1 = arith.constant 0 : i32
    return %c0_i32, %c0_i32_0 : i32, i32
  }
  func.func @transform_2(%arg0: i32) -> (i32, i32) {
    %c0_i32 = arith.constant 0 : i32
    %c0_i32_0 = arith.constant 0 : i32
    %c0_i32_1 = arith.constant 0 : i32
    return %c0_i32, %c0_i32_0 : i32, i32
  }
  func.func @transform_3(%arg0: i32) -> (i32, i32) {
    %c0_i32 = arith.constant 0 : i32
    %c0_i32_0 = arith.constant 0 : i32
    %c0_i32_1 = arith.constant 0 : i32
    return %c0_i32, %c0_i32_0 : i32, i32
  }
  func.func @transform_4(%arg0: i32) -> (i32, i32) {
    %c0_i32 = arith.constant 0 : i32
    %c0_i32_0 = arith.constant 0 : i32
    return %c0_i32, %arg0 : i32, i32
  }
}

</mosaic_0001>

<bundles_post_ra>
// kernel: tpu_custom_call.1
= control target key start
LH: loop header
LB: loop body
LE: loop exit
PB: predicated region body
PF: predicated region fallthrough
CT: control target
= control target key end

     0   :  { %vm37_vm0 = vcmask 1043456   ;;  %vm30_vm1 = vcmask 31744   ;;  %vm22_vm2 = vcmask 15360   ;;  %vm118_vm3 = vcmask 130048   ;;  %s1367_s0 = inlined_call_operand.vmem [shape: f32[4,16], index: 0, kind: input, shape index: {}]   ;;  %s1368_s1 = inlined_call_operand.vmem [shape: f32[16,16], index: 1, kind: input, shape index: {}]   ;;  %s1369_s2 = inlined_call_operand.vmem [shape: f32[16,4], index: 2, kind: input, shape index: {}]   ;;  %s1370_s3 = inlined_call_operand.vmem [shape: f32[4,20], index: 3, kind: input, shape index: {}]   ;;  %s1371_s4 = inlined_call_operand.hbm [shape: f32[4,16], index: 4, kind: output, shape index: {}]  }
   0x1   :  { %v1274_v0 = vld [vmem:[%s1367_s0] sm:$0xf]  ;;  %v29_v2 = vld [vmem:[%s1369_s2 + $0x8] sm:$0xff]  ;;  %v1228_v4 = vmov 0.0  }
   0x2   :  { %v28_v1 = vld [vmem:[%s1369_s2] sm:$0xff]  ;;  %1014 = vmatprep.subr.msk.mxu0 %vm37_vm0, %v1274_v0  ;;  %23 = vst.msk [vmem:[#allocation2] sm:$0xff] %vm22_vm2, %v1228_v4  ;;  %24 = vst.msk [vmem:[#allocation2 + $0x8] sm:$0xff] %vm22_vm2, %v1228_v4 }
   0x3   :  { %1016 = vmatprep.mubr.msk.f32.mxu0 %vm30_vm1, %v28_v1  ;;  %v1288_v3 = vld [vmem:[%s1368_s1] sm:$0xff]  ;;  %1015 = vmatpush3.msk.msra.mxu0 %vm37_vm0, %v1274_v0 }
   0x4   :  { %1023 = vmatprep.mubr.msk.f32.mxu1 %vm118_vm3, %v1288_v3 }
   0x5   :  { %9 = vsyncpa [#allocation4], 0  ;;  %1017 = vmatmul.mubr.msk.f32.vlgmr.msra.gmra.mrb[0].mxu0 %vm30_vm1, %v29_v2  ;;  %v1304_v8 = vld [vmem:[%s1368_s1 + $0x8] sm:$0xff]  ;;  %s1229_s23 = smov 124   ;;  %s1230_s24 = smov 126   ;;  %vm1243_vm4 = vmmov 0  }
   0x6   :  { %1030 = vmatprep.mubr.msk.f32.mxu0 %vm118_vm3, %v1288_v3  ;;  %s1231_s25 = smov 122   ;;  %s1232_s1 = smov 120   ;;  %vm848_vm5 = vcmask 48128   ;;  %vm851_vm6 = vcmask 64512   ;;  %vm854_vm7 = vcmask 80896   ;;  %vm857_vm8 = vcmask 97280  }
   0x7   :  { %s1233_s26 = smov 118   ;;  %s1234_s27 = smov 116   ;;  %vm860_vm9 = vcmask 113664   ;;  %vm864_vm10 = vcmask 162816   ;;  %vm938_vm11 = vcmask 125952  }
   0x8   :  { %s1235_s28 = smov 114   ;;  %s1236_s29 = smov 2  }
   0x9   :  { %v116_v5 = vld [vmem:[#allocation2] sm:$0xff]  ;;  %v117_v6 = vld [vmem:[#allocation2 + $0x8] sm:$0xff]  ;;  %s1237_s30 = smov 4   ;;  %s1238_s5 = smov 6  }
   0xa   :  { %v1084_v7 = vpack.c.bf16 %v117_v6, %v116_v5  ;;  %s1239_s6 = smov 8   ;;  %s1240_s7 = smov 10  }
   0xb   :  { %s1241_s8 = smov 12   ;;  %s1244_s9 = smov 14  }
   0xc   :  { %1085 = vmatprep.subr.bf16.mxu1 %v1084_v7  ;;  %s1245_s12 = smov [#allocation3]  }
   0xd   :  { %1087 = vmatpush3.bf16.msra.mxu1 %v1084_v7  ;;  %s946_s13 = sshll.u32 %s1245_s12, 4  ;;  %s947_s13 = int_to_ptr.vmem [resolvable:$true] %s946_s13 }
   0xe   :  { %s1204_s14 = scalar_lea.vmem %s947_s13, 64  ;;  %p1209_p1 = scmp.lt.s32.totalorder %s947_s13, %s947_s13 }
   0xf   :  { %p1205_p0 = scmp.ne.s32.totalorder %s947_s13, %s1204_s14  ;;  %p1210_p2 = scmp.lt.s32.totalorder %s1204_s14, %s1204_s14 }
  0x10   :  { %1024 = vmatmul.mubr.msk.f32.vlgmr.msra.gmra.mrb[0].mxu1 %vm118_vm3, %v1304_v8 }
  0x11   :  { %1037 = vmatprep.mubr.msk.f32.mxu1 %vm118_vm3, %v1288_v3  ;;  %p1211_p3 = por %p1210_p2, %p1209_p1 }
  0x13   :  { %p1212_p4 = pnand %p1211_p3, %p1205_p0 }
  0xd8   :  { %v1018_v9 = vpop.f32.mrb[0].mxu0 }
  0xd9   :  { %v107_v10 = vpop.f32.mrb[1].mxu0 }
  0xda   :  { %287 = vrot.lane.b32.xlu1 %v107_v10, %s1229_s23  ;;  %204 = vrot.lane.b32.xlu0 %v107_v10, %s1230_s24 }
  0xde   :  { %289 = vrot.lane.b32.xlu1 %v1018_v9, %s1229_s23  ;;  %206 = vrot.lane.b32.xlu0 %v1018_v9, %s1230_s24 }
  0xe2   :  { %372 = vrot.lane.b32.xlu1 %v1018_v9, %s1231_s25  ;;  %370 = vrot.lane.b32.xlu0 %v107_v10, %s1231_s25 }
  0xe3   :  { %v1025_v11 = vpop.f32.mrb[0].mxu1 }
  0xe4   :  { %v197_v12 = vadd.f32 %v1025_v11, %v1018_v9  ;;  %v191_v13 = vpop.f32.mrb[1].mxu1 }
  0xe5   :  { %v192_v14 = vadd.f32 %v191_v13, %v107_v10 }
  0xe6   :  { %455 = vrot.lane.b32.xlu1 %v1018_v9, %s1232_s1  ;;  %453 = vrot.lane.b32.xlu0 %v107_v10, %s1232_s1  ;;  %1172 = vtanh.f32 %v197_v12 }
  0xe7   :  { %1174 = vtanh.f32 %v192_v14 }
  0xea   :  { %538 = vrot.lane.b32.xlu1 %v1018_v9, %s1233_s26  ;;  %536 = vrot.lane.b32.xlu0 %v107_v10, %s1233_s26 }
  0xee   :  { %621 = vrot.lane.b32.xlu1 %v1018_v9, %s1234_s27  ;;  %619 = vrot.lane.b32.xlu0 %v107_v10, %s1234_s27 }
  0xf0   :  { %v1310_v15 = vpop.eup %1172 }
  0xf1   :  { %v1312_v16 = vpop.eup %1174 }
  0xf2   :  { %704 = vrot.lane.b32.xlu1 %v1018_v9, %s1235_s28  ;;  %702 = vrot.lane.b32.xlu0 %v107_v10, %s1235_s28  ;;  %v1088_v17 = vpack.c.bf16 %v1310_v15, %v1312_v16 }
  0xf4   :  { %1089 = vmatprep.subr.bf16.mxu0 %v1088_v17 }
  0xf5   :  { %1091 = vmatpush3.bf16.msra.mxu0 %v1088_v17 }
  0xf8   :  { %1031 = vmatmul.mubr.msk.f32.vlgmr.msra.gmra.mrb[2].mxu0 %vm118_vm3, %v1304_v8 }
  0xf9   :  { %1044 = vmatprep.mubr.msk.f32.mxu0 %vm118_vm3, %v1288_v3 }
 0x14c   :  { %v205_v18 = vpop.permute.xlu0 %204  ;;  %v288_v28 = vpop.permute.xlu1 %287 }
 0x150   :  { %v207_v19 = vpop.permute.xlu0 %206  ;;  %v290_v29 = vpop.permute.xlu1 %289 }
 0x154   :  { %v373_v38 = vpop.permute.xlu1 %372  ;;  %v371_v40 = vpop.permute.xlu0 %370 }
 0x158   :  { %v456_v48 = vpop.permute.xlu1 %455  ;;  %v454_v50 = vpop.permute.xlu0 %453 }
 0x15c   :  { %v539_v58 = vpop.permute.xlu1 %538  ;;  %v537_v60 = vpop.permute.xlu0 %536 }
 0x160   :  { %v620_v9 = vpop.permute.xlu0 %619 }
 0x1cb   :  { %v1032_v20 = vpop.f32.mrb[2].mxu0 }
 0x1cc   :  { %v282_v21 = vadd.f32 %v1032_v20, %v207_v19  ;;  %v276_v22 = vpop.f32.mrb[3].mxu0 }
 0x1cd   :  { %v277_v23 = vadd.f32 %v276_v22, %v205_v18 }
 0x1ce   :  { %1176 = vtanh.f32 %v282_v21  ;;  %v703_v21 = vpop.permute.xlu0 %702 }
 0x1cf   :  { %1178 = vtanh.f32 %v277_v23 }
 0x1d8   :  { %v1177_v24 = vpop.eup %1176 }
 0x1d9   :  { %v1179_v25 = vpop.eup %1178 }
 0x1da   :  { %v1137_v26 = vpack.i.bf16 %v1177_v24, %v1179_v25  ;;  %v1092_v27 = vpack.c.bf16 %v1177_v24, %v1179_v25  ;;  %v1242_v25 = vmov 0.0|0.0  }
 0x1dc   :  { %1138 = vrot.lane.b32.xlu0 %v1137_v26, %s1236_s29  ;;  %1093 = vmatprep.subr.bf16.mxu1 %v1092_v27 }
 0x1dd   :  { %1095 = vmatpush3.bf16.msra.mxu1 %v1092_v27 }
 0x1e0   :  { %1038 = vmatmul.mubr.msk.f32.vlgmr.msra.gmra.mrb[2].mxu1 %vm118_vm3, %v1304_v8 }
 0x1e1   :  { %1051 = vmatprep.mubr.msk.f32.mxu1 %vm118_vm3, %v1288_v3 }
 0x2b3   :  { %v1039_v30 = vpop.f32.mrb[2].mxu1 }
 0x2b4   :  { %v365_v31 = vadd.f32 %v1039_v30, %v290_v29  ;;  %v359_v32 = vpop.f32.mrb[3].mxu1 }
 0x2b5   :  { %v360_v33 = vadd.f32 %v359_v32, %v288_v28  ;;  %v1139_v28 = vpop.permute.xlu0 %1138 }
 0x2b6   :  { %1180 = vtanh.f32 %v365_v31  ;;  %v1141_v31 = vunpack.i.h.bf16 %v1139_v28 }
 0x2b7   :  { %1182 = vtanh.f32 %v360_v33  ;;  %v1140_v33 = vunpack.i.l.bf16 %v1139_v28 }
 0x2c0   :  { %v1181_v34 = vpop.eup %1180 }
 0x2c1   :  { %v1183_v35 = vpop.eup %1182 }
 0x2c2   :  { %v1142_v36 = vpack.i.bf16 %v1181_v34, %v1183_v35  ;;  %v1096_v37 = vpack.c.bf16 %v1181_v34, %v1183_v35 }
 0x2c4   :  { %1143 = vrot.lane.b32.xlu1 %v1142_v36, %s1237_s30  ;;  %1097 = vmatprep.subr.bf16.mxu0 %v1096_v37 }
 0x2c5   :  { %1099 = vmatpush3.bf16.msra.mxu0 %v1096_v37  ;;  %v845_v37 = vsel %vm22_vm2, %v1310_v15, %v1141_v31 }
 0x2c8   :  { %1045 = vmatmul.mubr.msk.f32.vlgmr.msra.gmra.mrb[4].mxu0 %vm118_vm3, %v1304_v8 }
 0x2c9   :  { %1058 = vmatprep.mubr.msk.f32.mxu0 %vm118_vm3, %v1288_v3 }
 0x39b   :  { %v1046_v39 = vpop.f32.mrb[4].mxu0 }
 0x39c   :  { %v448_v41 = vadd.f32 %v1046_v39, %v373_v38  ;;  %v442_v42 = vpop.f32.mrb[5].mxu0 }
 0x39d   :  { %v443_v43 = vadd.f32 %v442_v42, %v371_v40 }
 0x39e   :  { %1184 = vtanh.f32 %v448_v41  ;;  %v844_v41 = vsel %vm22_vm2, %v1312_v16, %v1140_v33 }
 0x39f   :  { %1186 = vtanh.f32 %v443_v43 }
 0x3a8   :  { %v1185_v44 = vpop.eup %1184 }
 0x3a9   :  { %v1187_v45 = vpop.eup %1186 }
 0x3aa   :  { %v1147_v46 = vpack.i.bf16 %v1185_v44, %v1187_v45  ;;  %v1100_v47 = vpack.c.bf16 %v1185_v44, %v1187_v45 }
 0x3ac   :  { %1148 = vrot.lane.b32.xlu0 %v1147_v46, %s1238_s5  ;;  %1101 = vmatprep.subr.bf16.mxu1 %v1100_v47 }
 0x3ad   :  { %1103 = vmatpush3.bf16.msra.mxu1 %v1100_v47 }
 0x3b0   :  { %1052 = vmatmul.mubr.msk.f32.vlgmr.msra.gmra.mrb[4].mxu1 %vm118_vm3, %v1304_v8 }
 0x3b1   :  { %1065 = vmatprep.mubr.msk.f32.mxu1 %vm118_vm3, %v1288_v3 }
 0x41e   :  { %v1149_v30 = vpop.permute.xlu0 %1148 }
 0x41f   :  { %v1151_v38 = vunpack.i.h.bf16 %v1149_v30  ;;  %v1150_v39 = vunpack.i.l.bf16 %v1149_v30 }
 0x483   :  { %v1053_v49 = vpop.f32.mrb[4].mxu1 }
 0x484   :  { %v531_v51 = vadd.f32 %v1053_v49, %v456_v48  ;;  %v525_v52 = vpop.f32.mrb[5].mxu1 }
 0x485   :  { %v526_v53 = vadd.f32 %v525_v52, %v454_v50 }
 0x486   :  { %1188 = vtanh.f32 %v531_v51 }
 0x487   :  { %1190 = vtanh.f32 %v526_v53 }
 0x490   :  { %v1189_v54 = vpop.eup %1188 }
 0x491   :  { %v1191_v55 = vpop.eup %1190 }
 0x492   :  { %v1152_v56 = vpack.i.bf16 %v1189_v54, %v1191_v55  ;;  %v1104_v57 = vpack.c.bf16 %v1189_v54, %v1191_v55 }
 0x494   :  { %1153 = vrot.lane.b32.xlu1 %v1152_v56, %s1239_s6  ;;  %1105 = vmatprep.subr.bf16.mxu0 %v1104_v57 }
 0x495   :  { %1107 = vmatpush3.bf16.msra.mxu0 %v1104_v57 }
 0x498   :  { %1059 = vmatmul.mubr.msk.f32.vlgmr.msra.gmra.mrb[6].mxu0 %vm118_vm3, %v1304_v8 }
 0x499   :  { %1072 = vmatprep.mubr.msk.f32.mxu0 %vm118_vm3, %v1288_v3  ;;  %v622_v3 = vpop.permute.xlu1 %621 }
 0x49d   :  { %v705_v19 = vpop.permute.xlu1 %704 }
 0x4a1   :  { %v1144_v29 = vpop.permute.xlu1 %1143 }
 0x4a2   :  { %v1146_v34 = vunpack.i.h.bf16 %v1144_v29  ;;  %v1145_v35 = vunpack.i.l.bf16 %v1144_v29 }
 0x4a4   :  { %v847_v44 = vsel %vm30_vm1, %v845_v37, %v1146_v34  ;;  %v846_v47 = vsel %vm30_vm1, %v844_v41, %v1145_v35 }
 0x4a5   :  { %v850_v15 = vsel %vm848_vm5, %v847_v44, %v1151_v38  ;;  %v849_v50 = vsel %vm848_vm5, %v846_v47, %v1150_v39 }
 0x506   :  { %v1154_v32 = vpop.permute.xlu1 %1153 }
 0x507   :  { %v1156_v42 = vunpack.i.h.bf16 %v1154_v32  ;;  %v1155_v43 = vunpack.i.l.bf16 %v1154_v32 }
 0x509   :  { %v853_v51 = vsel %vm851_vm6, %v850_v15, %v1156_v42  ;;  %v852_v52 = vsel %vm851_vm6, %v849_v50, %v1155_v43 }
 0x56b   :  { %v1060_v59 = vpop.f32.mrb[6].mxu0 }
 0x56c   :  { %v614_v61 = vadd.f32 %v1060_v59, %v539_v58  ;;  %v608_v62 = vpop.f32.mrb[7].mxu0 }
 0x56d   :  { %v609_v63 = vadd.f32 %v608_v62, %v537_v60  ;;  %v863_v62 = vld [vmem:[%s1370_s3] sm:$0xf] }
 0x56e   :  { %1192 = vtanh.f32 %v614_v61 }
 0x56f   :  { %1194 = vtanh.f32 %v609_v63 }
 0x578   :  { %v1193_v1 = vpop.eup %1192 }
 0x579   :  { %v1195_v2 = vpop.eup %1194 }
 0x57a   :  { %v1157_v5 = vpack.i.bf16 %v1193_v1, %v1195_v2  ;;  %v1108_v6 = vpack.c.bf16 %v1193_v1, %v1195_v2 }
 0x57c   :  { %1158 = vrot.lane.b32.xlu0 %v1157_v5, %s1240_s7  ;;  %1109 = vmatprep.subr.bf16.mxu1 %v1108_v6 }
 0x57d   :  { %1111 = vmatpush3.bf16.msra.mxu1 %v1108_v6 }
 0x57e   :  { %1116 = vmatprep.subr.bf16.mxu1 %v1242_v25 }
 0x580   :  { %1066 = vmatmul.mubr.msk.f32.vlgmr.msra.gmra.mrb[6].mxu1 %vm118_vm3, %v1304_v8 }
 0x581   :  { %1081 = vmatprep.mubr.msk.f32.mxu1 %vm1243_vm4, %v1228_v4 }
 0x5ee   :  { %v1159_v36 = vpop.permute.xlu0 %1158 }
 0x5ef   :  { %v1161_v45 = vunpack.i.h.bf16 %v1159_v36  ;;  %v1160_v46 = vunpack.i.l.bf16 %v1159_v36 }
 0x5f1   :  { %v856_v53 = vsel %vm854_vm7, %v853_v51, %v1161_v45  ;;  %v855_v54 = vsel %vm854_vm7, %v852_v52, %v1160_v46 }
 0x653   :  { %v1067_v7 = vpop.f32.mrb[6].mxu1 }
 0x654   :  { %v697_v10 = vadd.f32 %v1067_v7, %v622_v3  ;;  %v691_v11 = vpop.f32.mrb[7].mxu1 }
 0x655   :  { %v692_v12 = vadd.f32 %v691_v11, %v620_v9 }
 0x656   :  { %1196 = vtanh.f32 %v697_v10 }
 0x657   :  { %1198 = vtanh.f32 %v692_v12 }
 0x660   :  { %v1197_v13 = vpop.eup %1196 }
 0x661   :  { %v1199_v14 = vpop.eup %1198 }
 0x662   :  { %v1162_v17 = vpack.i.bf16 %v1197_v13, %v1199_v14  ;;  %v1112_v18 = vpack.c.bf16 %v1197_v13, %v1199_v14 }
 0x664   :  { %1163 = vrot.lane.b32.xlu1 %v1162_v17, %s1241_s8  ;;  %1113 = vmatprep.subr.bf16.mxu0 %v1112_v18 }
 0x665   :  { %1115 = vmatpush3.bf16.msra.mxu0 %v1112_v18 }
 0x668   :  { %1073 = vmatmul.mubr.msk.f32.vlgmr.msra.gmra.mrb[8].mxu0 %vm118_vm3, %v1304_v8 }
 0x6d6   :  { %v1164_v40 = vpop.permute.xlu1 %1163 }
 0x6d7   :  { %v1166_v48 = vunpack.i.h.bf16 %v1164_v40  ;;  %v1165_v49 = vunpack.i.l.bf16 %v1164_v40 }
 0x6d9   :  { %v859_v57 = vsel %vm857_vm8, %v856_v53, %v1166_v48  ;;  %v858_v58 = vsel %vm857_vm8, %v855_v54, %v1165_v49 }
 0x73b   :  { %v1074_v20 = vpop.f32.mrb[8].mxu0 }
 0x73c   :  { %v780_v22 = vadd.f32 %v1074_v20, %v705_v19  ;;  %v774_v23 = vpop.f32.mrb[9].mxu0 }
 0x73d   :  { %v775_v24 = vadd.f32 %v774_v23, %v703_v21 }
 0x73e   :  { %1200 = vtanh.f32 %v780_v22 }
 0x73f   :  { %1202 = vtanh.f32 %v775_v24 }
 0x748   :  { %v1201_v26 = vpop.eup %1200 }
 0x749   :  { %v1203_v27 = vpop.eup %1202  ;;  %787 = vst.msk [vmem:[#allocation2 + $0x8] sm:$0xff] %vm22_vm2, %v1201_v26 }
 0x74a   :  { %786 = vst.msk [vmem:[#allocation2] sm:$0xff] %vm22_vm2, %v1203_v27  ;;  %v1167_v8 = vpack.i.bf16 %v1201_v26, %v1203_v27 }
 0x74c   :  { %1168 = vrot.lane.b32.xlu0 %v1167_v8, %s1244_s9 }
 0x7be   :  { %v1169_v16 = vpop.permute.xlu0 %1168 }
 0x7bf   :  { %v1171_v55 = vunpack.i.h.bf16 %v1169_v16  ;;  %v1170_v56 = vunpack.i.l.bf16 %v1169_v16 }
 0x7c1   :  { %v862_v59 = vsel %vm860_vm9, %v859_v57, %v1171_v55  ;;  %v861_v60 = vsel %vm860_vm9, %v858_v58, %v1170_v56 }
 0x7c2   :  { %v1117_v61 = vpack.c.bf16 %v862_v59, %v861_v60 }
 0x7c4   :  { %1118 = vmatpush3.bf16.msra.mxu1 %v1117_v61 }
 0x7c5   :  { %1079 = vmatprep.subr.mxu1 %v1228_v4 }
 0x7c8   :  { %1080 = vmatpush3.msk.msra.mxu1 %vm37_vm0, %v1274_v0 }
 0x7c9   :  { %1082 = vmatmul.mubr.msk.f32.vlgmr.msra.gmra.mrb[8].mxu1 %vm864_vm10, %v863_v62 }
 0x89c   :  { %v934_v63 = vpop.f32.mrb[8].mxu1 }
 0x89d   :  { %939 = vst.msk [vmem:[#allocation3] sm:$0xf] %vm938_vm11, %v934_v63  ;;  %v1083_v1 = vpop.f32.mrb[9].mxu1 }
 0x89e   :  { %1215 = shalt.err (!%p1212_p4)
}
 0x89f   :  { %s1216_s16 = scalar_lea.hbm %s1371_s4, 64 }
 0x8a0   :  { %p1217_p5 = scmp.ne.s32.totalorder %s1371_s4, %s1216_s16  ;;  %p1220_p6 = scmp.lt.u32.totalorder %s1216_s16, %s1371_s4 }
 0x8a2   :  { %p1222_p7 = pnand %p1220_p6, %p1217_p5 }
 0x8a4   :  { %1225 = shalt.err (!%p1222_p7)
}
 0x8a5   :  { %949 = dma.vmem_to_hbm [thread:$0]  %s947_s13, 64, %s1371_s4, [#allocation4]  }
 0x8a6   :  { %1226 = dma.done.wait [#allocation4], 64  }
 0x8a7   :  { %1227 = vsyncadd [#allocation4], 4294967232 }
 0x8a8   :  { %953 = vsyncpa [#allocation4], 1 }

</bundles_post_ra>
